<compile_context>
chip_gen: v6e
topology: v6e:2x2x1
jax: 0.10.0
libtpu: 0.0.40
codegen_flags: <defaults>
</compile_context>

<pallas_src>
import jax
import jax.numpy as jnp
from jax.experimental import pallas as pl
from jax.experimental.pallas import tpu as pltpu


def _round_up(x, m):
    return (x + m - 1) // m * m


def _pick_tile_rows(hp, wcp1, c4, elem_bytes=2, budget_bytes=2 << 20):
    """Largest divisor of hp whose band tile (with TPU lane/sublane padding) fits the budget."""
    best = 1
    for th in range(1, hp + 1):
        if hp % th:
            continue
        rows = 2 * th + 1
        padded = rows * _round_up(wcp1, 8) * _round_up(c4, 128) * elem_bytes
        if padded <= budget_bytes:
            best = th
    return best


def _make_kernel(th, wc, wp, c4, cout_p):
    nr = 2 * th  # conv rows per pooled-row tile

    def kernel(band_ref, w_ref, b_ref, out_ref):
        # band_ref: (1, 1, 2*th+1, wc+1, c4)  bf16  space-to-depth rows (+1 halo row, +1 pad col)
        # w_ref   : (4, c4, cout_p)           bf16  2x2-conv taps, (dy, dx) major
        # b_ref   : (1, cout_p)               f32
        # out_ref : (1, 1, th*wp, cout_p)
        band = band_ref[0, 0]
        acc = jnp.zeros((nr * wc, cout_p), jnp.float32)
        # stride-1 2x2 conv == 4 unit-shifted slices, accumulated in one f32 accumulator.
        # All 4 maxpool positions of every pooled pixel are rows of this same conv output.
        for k, (dy, dx) in enumerate(((0, 0), (0, 1), (1, 0), (1, 1))):
            a = band[dy:dy + nr, dx:dx + wc, :].reshape(nr * wc, c4)
            acc += jnp.dot(a, w_ref[k], preferred_element_type=jnp.float32)
        # MaxPool2d(2,2): pair-max along W then along H, all in f32.
        conv = acc.reshape(nr * wp, 2, cout_p)
        m_w = jnp.maximum(conv[:, 0, :], conv[:, 1, :])        # (nr*wp, cout_p)
        m_w = m_w.reshape(th, 2, wp, cout_p)
        pooled = jnp.maximum(m_w[:, 0], m_w[:, 1])             # (th, wp, cout_p)
        out = pooled.reshape(th * wp, cout_p) + b_ref[...]     # bias after max == max(conv+bias)
        out_ref[0, 0] = out.astype(out_ref.dtype)

    return kernel


@jax.jit
def downsampling_block(x_nchw, w_oihw, bias):
    """x: (N,Cin,H,W); w: (Cout,Cin,3,3); b: (Cout,) -> (N,Cout,H//4,W//4)."""
    n, cin, h, w = x_nchw.shape
    cout = w_oihw.shape[0]
    assert h % 4 == 0 and w % 4 == 0, "H and W must be multiples of 4"
    hc, wc = h // 2, w // 2          # conv output size
    hp, wp = hc // 2, wc // 2        # pooled output size
    c4 = 4 * cin                     # space-to-depth channels
    cout_p = _round_up(cout, 128)    # lane-dense output channels

    # ---- glue (one fused XLA pass over x): space-to-depth + pad + band split ----
    # SD[n, hb, wb, (r, c, ci)] = x[n, ci, 2*hb + r, 2*wb + c]
    sd = x_nchw.reshape(n, cin, hc, 2, wc, 2)
    sd = jnp.transpose(sd, (0, 2, 4, 3, 5, 1)).reshape(n, hc, wc, c4)
    # 3x3/s2/p1 conv on x == 2x2/s1 conv on SD padded by one zero row/col at top/left.
    sdp = jnp.pad(sd, ((0, 0), (1, 0), (1, 0), (0, 0)))        # (n, hc+1, wc+1, c4)

    th = _pick_tile_rows(hp, wc + 1, c4)
    t = hp // th
    rb = 2 * th + 1
    main = sdp[:, : 2 * hp].reshape(n, t, 2 * th, wc + 1, c4)
    halo = sdp[:, 2 * th:: 2 * th][:, :, None]                 # (n, t, 1, wc+1, c4)
    bands = jnp.concatenate([main, halo], axis=2).astype(jnp.bfloat16)

    # ---- weights: 3x3 stride-2 taps -> 2x2 stride-1 taps over space-to-depth channels ----
    # (window offset d, input parity) -> original 3x3 tap index k.
    dpk = ((0, 1, 0), (1, 0, 1), (1, 1, 2))
    w2 = jnp.zeros((2, 2, 2, 2, cin, cout), w_oihw.dtype)
    for dy, r, ky in dpk:
        for dx, c, kx in dpk:
            w2 = w2.at[dy, dx, r, c].set(jnp.transpose(w_oihw[:, :, ky, kx], (1, 0)))
    w2 = w2.reshape(4, c4, cout)
    w2 = jnp.pad(w2, ((0, 0), (0, 0), (0, cout_p - cout))).astype(jnp.bfloat16)
    b2 = jnp.pad(bias.astype(jnp.float32), (0, cout_p - cout)).reshape(1, cout_p)

    kernel = _make_kernel(th, wc, wp, c4, cout_p)
    out = pl.pallas_call(
        kernel,
        out_shape=jax.ShapeDtypeStruct((n, t, th * wp, cout_p), x_nchw.dtype),
        grid=(n, t),
        in_specs=[
            pl.BlockSpec((1, 1, rb, wc + 1, c4), lambda i, j: (i, j, 0, 0, 0)),
            pl.BlockSpec((4, c4, cout_p), lambda i, j: (0, 0, 0)),
            pl.BlockSpec((1, cout_p), lambda i, j: (0, 0)),
        ],
        out_specs=pl.BlockSpec((1, 1, th * wp, cout_p), lambda i, j: (i, j, 0, 0)),
        compiler_params=pltpu.CompilerParams(
            dimension_semantics=("parallel", "parallel"),
            vmem_limit_bytes=32 * 1024 * 1024,
        ),
    )(bands, w2, b2)

    out = out.reshape(n, hp, wp, cout_p)[..., :cout]
    # Public API matches PyTorch (NCHW); this transpose touches only the 16x-smaller output.
    return jnp.transpose(out, (0, 3, 1, 2))


def _reference(x, w, b):
    conv = jax.lax.conv_general_dilated(
        x, w, window_strides=(2, 2), padding=((1, 1), (1, 1)),
        dimension_numbers=("NCHW", "OIHW", "NCHW"))
    conv = conv + b[None, :, None, None]
    return jax.lax.reduce_window(
        conv, -jnp.inf, jax.lax.max,
        window_dimensions=(1, 1, 2, 2), window_strides=(1, 1, 2, 2), padding="VALID")


if __name__ == "__main__":
    key = jax.random.PRNGKey(0)
    kx, kw, kb = jax.random.split(key, 3)

    n, cin, h, w = 2, 4, 16, 16
    cout = 8

    x = jax.random.normal(kx, (n, cin, h, w), dtype=jnp.float32)
    fan_in = cin * 3 * 3
    bound = 1.0 / (fan_in ** 0.5)
    wgt = jax.random.uniform(kw, (cout, cin, 3, 3), jnp.float32, -bound, bound)
    b = jax.random.uniform(kb, (cout,), jnp.float32, -bound, bound)

    out = downsampling_block(x, wgt, b)
    out = jax.block_until_ready(out)

    # Kernel feeds the MXU bf16 inputs with f32 accumulation, so compare against a reference
    # computed from the same bf16-rounded x/w (bias kept f32 on both sides).
    x_r = x.astype(jnp.bfloat16).astype(jnp.float32)
    w_r = wgt.astype(jnp.bfloat16).astype(jnp.float32)
    ref = _reference(x_r, w_r, b)

    assert out.shape == ref.shape == (n, cout, h // 4, w // 4)
    assert jnp.allclose(out, ref, atol=1e-3, rtol=1e-3), float(jnp.max(jnp.abs(out - ref)))
    print("KERNEL_OK")
</pallas_src>

<mosaic_0001>
module attributes {stable_mosaic.version = 11 : i64} {
  func.func @kernel(%arg0: i32, %arg1: i32, %arg2: memref<1x1x9x9x16xbf16, #tpu.memory_space<vmem>>, %arg3: memref<4x16x128xbf16, #tpu.memory_space<vmem>>, %arg4: memref<1x128xf32, #tpu.memory_space<vmem>>, %arg5: memref<1x1x16x128xf32, #tpu.memory_space<vmem>>) attributes {dimension_semantics = [#tpu.dimension_semantics<parallel>, #tpu.dimension_semantics<parallel>], iteration_bounds = array<i64: 2, 1>, scalar_prefetch = 0 : i64, scratch_operands = 0 : i64, tpu.core_type = #tpu.core_type<tc>, window_params = [{transform_indices = @transform_0, window_bounds = array<i64: 1, 1, 9, 9, 16>}, {pipeline_mode = #tpu.pipeline_mode<synchronous>, transform_indices = @transform_1, window_bounds = array<i64: 4, 16, 128>}, {pipeline_mode = #tpu.pipeline_mode<synchronous>, transform_indices = @transform_2, window_bounds = array<i64: 1, 128>}, {transform_indices = @transform_3, window_bounds = array<i64: 1, 1, 16, 128>}]} {
    %c0 = arith.constant 0 : index
    %c0_0 = arith.constant 0 : index
    %c0_1 = arith.constant 0 : index
    %c0_2 = arith.constant 0 : index
    %c0_3 = arith.constant 0 : index
    %0 = vector.load %arg2[%c0, %c0_0, %c0_1, %c0_2, %c0_3] : memref<1x1x9x9x16xbf16, #tpu.memory_space<vmem>>, vector<1x1x9x9x16xbf16>
    %1 = vector.shape_cast %0 : vector<1x1x9x9x16xbf16> to vector<9x9x16xbf16>
    %cst = arith.constant 0.000000e+00 : f32
    %2 = vector.broadcast %cst : f32 to vector<64x128xf32>
    %3 = vector.extract_strided_slice %1 {offsets = [0, 0, 0], sizes = [8, 8, 16], strides = [1, 1, 1]} : vector<9x9x16xbf16> to vector<8x8x16xbf16>
    %4 = vector.shape_cast %3 : vector<8x8x16xbf16> to vector<64x16xbf16>
    %c0_4 = arith.constant 0 : index
    %c0_5 = arith.constant 0 : index
    %c0_6 = arith.constant 0 : index
    %5 = vector.load %arg3[%c0_4, %c0_5, %c0_6] : memref<4x16x128xbf16, #tpu.memory_space<vmem>>, vector<1x16x128xbf16>
    %6 = vector.shape_cast %5 : vector<1x16x128xbf16> to vector<16x128xbf16>
    %cst_7 = arith.constant dense<0.000000e+00> : vector<64x128xf32>
    %7 = tpu.matmul %4, %6, %cst_7 {dimension_numbers = #tpu.dot_dimension_numbers<[1], [0], [0], [1], [0, 0, 1, 1], [], []>} : vector<64x16xbf16>, vector<16x128xbf16>, vector<64x128xf32> -> vector<64x128xf32>
    %8 = arith.addf %2, %7 : vector<64x128xf32>
    %9 = vector.extract_strided_slice %1 {offsets = [0, 1, 0], sizes = [8, 8, 16], strides = [1, 1, 1]} : vector<9x9x16xbf16> to vector<8x8x16xbf16>
    %10 = vector.shape_cast %9 : vector<8x8x16xbf16> to vector<64x16xbf16>
    %c1 = arith.constant 1 : index
    %c0_8 = arith.constant 0 : index
    %c0_9 = arith.constant 0 : index
    %11 = vector.load %arg3[%c1, %c0_8, %c0_9] : memref<4x16x128xbf16, #tpu.memory_space<vmem>>, vector<1x16x128xbf16>
    %12 = vector.shape_cast %11 : vector<1x16x128xbf16> to vector<16x128xbf16>
    %cst_10 = arith.constant dense<0.000000e+00> : vector<64x128xf32>
    %13 = tpu.matmul %10, %12, %cst_10 {dimension_numbers = #tpu.dot_dimension_numbers<[1], [0], [0], [1], [0, 0, 1, 1], [], []>} : vector<64x16xbf16>, vector<16x128xbf16>, vector<64x128xf32> -> vector<64x128xf32>
    %14 = arith.addf %8, %13 : vector<64x128xf32>
    %15 = vector.extract_strided_slice %1 {offsets = [1, 0, 0], sizes = [8, 8, 16], strides = [1, 1, 1]} : vector<9x9x16xbf16> to vector<8x8x16xbf16>
    %16 = vector.shape_cast %15 : vector<8x8x16xbf16> to vector<64x16xbf16>
    %c2 = arith.constant 2 : index
    %c0_11 = arith.constant 0 : index
    %c0_12 = arith.constant 0 : index
    %17 = vector.load %arg3[%c2, %c0_11, %c0_12] : memref<4x16x128xbf16, #tpu.memory_space<vmem>>, vector<1x16x128xbf16>
    %18 = vector.shape_cast %17 : vector<1x16x128xbf16> to vector<16x128xbf16>
    %cst_13 = arith.constant dense<0.000000e+00> : vector<64x128xf32>
    %19 = tpu.matmul %16, %18, %cst_13 {dimension_numbers = #tpu.dot_dimension_numbers<[1], [0], [0], [1], [0, 0, 1, 1], [], []>} : vector<64x16xbf16>, vector<16x128xbf16>, vector<64x128xf32> -> vector<64x128xf32>
    %20 = arith.addf %14, %19 : vector<64x128xf32>
    %21 = vector.extract_strided_slice %1 {offsets = [1, 1, 0], sizes = [8, 8, 16], strides = [1, 1, 1]} : vector<9x9x16xbf16> to vector<8x8x16xbf16>
    %22 = vector.shape_cast %21 : vector<8x8x16xbf16> to vector<64x16xbf16>
    %c3 = arith.constant 3 : index
    %c0_14 = arith.constant 0 : index
    %c0_15 = arith.constant 0 : index
    %23 = vector.load %arg3[%c3, %c0_14, %c0_15] : memref<4x16x128xbf16, #tpu.memory_space<vmem>>, vector<1x16x128xbf16>
    %24 = vector.shape_cast %23 : vector<1x16x128xbf16> to vector<16x128xbf16>
    %cst_16 = arith.constant dense<0.000000e+00> : vector<64x128xf32>
    %25 = tpu.matmul %22, %24, %cst_16 {dimension_numbers = #tpu.dot_dimension_numbers<[1], [0], [0], [1], [0, 0, 1, 1], [], []>} : vector<64x16xbf16>, vector<16x128xbf16>, vector<64x128xf32> -> vector<64x128xf32>
    %26 = arith.addf %20, %25 : vector<64x128xf32>
    %27 = vector.shape_cast %26 : vector<64x128xf32> to vector<32x2x128xf32>
    %28 = vector.extract_strided_slice %27 {offsets = [0, 0, 0], sizes = [32, 1, 128], strides = [1, 1, 1]} : vector<32x2x128xf32> to vector<32x1x128xf32>
    %29 = vector.shape_cast %28 : vector<32x1x128xf32> to vector<32x128xf32>
    %30 = vector.extract_strided_slice %27 {offsets = [0, 1, 0], sizes = [32, 1, 128], strides = [1, 1, 1]} : vector<32x2x128xf32> to vector<32x1x128xf32>
    %31 = vector.shape_cast %30 : vector<32x1x128xf32> to vector<32x128xf32>
    %32 = arith.maximumf %29, %31 : vector<32x128xf32>
    %33 = vector.shape_cast %32 : vector<32x128xf32> to vector<4x2x4x128xf32>
    %34 = vector.extract_strided_slice %33 {offsets = [0, 0, 0, 0], sizes = [4, 1, 4, 128], strides = [1, 1, 1, 1]} : vector<4x2x4x128xf32> to vector<4x1x4x128xf32>
    %35 = vector.shape_cast %34 : vector<4x1x4x128xf32> to vector<4x4x128xf32>
    %36 = vector.extract_strided_slice %33 {offsets = [0, 1, 0, 0], sizes = [4, 1, 4, 128], strides = [1, 1, 1, 1]} : vector<4x2x4x128xf32> to vector<4x1x4x128xf32>
    %37 = vector.shape_cast %36 : vector<4x1x4x128xf32> to vector<4x4x128xf32>
    %38 = arith.maximumf %35, %37 : vector<4x4x128xf32>
    %39 = vector.shape_cast %38 : vector<4x4x128xf32> to vector<16x128xf32>
    %c0_17 = arith.constant 0 : index
    %c0_18 = arith.constant 0 : index
    %40 = vector.load %arg4[%c0_17, %c0_18] : memref<1x128xf32, #tpu.memory_space<vmem>>, vector<1x128xf32>
    %41 = vector.broadcast %40 : vector<1x128xf32> to vector<16x128xf32>
    %42 = arith.addf %39, %41 : vector<16x128xf32>
    %c0_19 = arith.constant 0 : index
    %c0_20 = arith.constant 0 : index
    %c0_21 = arith.constant 0 : index
    %c0_22 = arith.constant 0 : index
    %43 = vector.load %arg5[%c0_19, %c0_20, %c0_21, %c0_22] : memref<1x1x16x128xf32, #tpu.memory_space<vmem>>, vector<1x1x16x128xf32>
    %44 = vector.shape_cast %43 : vector<1x1x16x128xf32> to vector<16x128xf32>
    %45 = vector.shape_cast %42 : vector<16x128xf32> to vector<1x1x16x128xf32>
    tpu.vector_store %arg5[%c0_19, %c0_20, %c0_21, %c0_22], %45 {strides = array<i32>} : memref<1x1x16x128xf32, #tpu.memory_space<vmem>>, vector<1x1x16x128xf32>,
    return
  }
  func.func @transform_0(%arg0: i32, %arg1: i32) -> (i32, i32, i32, i32, i32) {
    %c0_i32 = arith.constant 0 : i32
    %c0_i32_0 = arith.constant 0 : i32
    %c0_i32_1 = arith.constant 0 : i32
    %c0_i32_2 = arith.constant 0 : i32
    return %arg0, %arg1, %c0_i32, %c0_i32_0, %c0_i32_1 : i32, i32, i32, i32, i32
  }
  func.func @transform_1(%arg0: i32, %arg1: i32) -> (i32, i32, i32) {
    %c0_i32 = arith.constant 0 : i32
    %c0_i32_0 = arith.constant 0 : i32
    %c0_i32_1 = arith.constant 0 : i32
    %c0_i32_2 = arith.constant 0 : i32
    return %c0_i32, %c0_i32_0, %c0_i32_1 : i32, i32, i32
  }
  func.func @transform_2(%arg0: i32, %arg1: i32) -> (i32, i32) {
    %c0_i32 = arith.constant 0 : i32
    %c0_i32_0 = arith.constant 0 : i32
    %c0_i32_1 = arith.constant 0 : i32
    return %c0_i32, %c0_i32_0 : i32, i32
  }
  func.func @transform_3(%arg0: i32, %arg1: i32) -> (i32, i32, i32, i32) {
    %c0_i32 = arith.constant 0 : i32
    %c0_i32_0 = arith.constant 0 : i32
    %c0_i32_1 = arith.constant 0 : i32
    return %arg0, %arg1, %c0_i32, %c0_i32_0 : i32, i32, i32, i32
  }
}

</mosaic_0001>

<bundles_post_ra>
// kernel: downsampling_block.1
= control target key start
LH: loop header
LB: loop body
LE: loop exit
PB: predicated region body
PF: predicated region fallthrough
CT: control target
= control target key end

     0   :  { %s1555_s12 = smov 0   ;;  %s1557_s13 = smov 0   ;;  %s1822_s0 = inlined_call_operand.vmem [shape: bf16[2,1,9,9,16], index: 0, kind: input, shape index: {}]   ;;  %s1823_s1 = inlined_call_operand.vmem [shape: bf16[4,16,128], index: 1, kind: input, shape index: {}]   ;;  %s1824_s2 = inlined_call_operand.vmem [shape: f32[1,128], index: 2, kind: input, shape index: {}]   ;;  %s1825_s3 = inlined_call_operand.vmem [shape: f32[2,1,16,128], index: 3, kind: output, shape index: {}]  }
   0x1   :  { %s1559_s14 = smov 0  }
   0x2 LB: > { %s25_s15 = sadd.s32 1, %s1528_s13  ;;  %p1330_p0 = scmp.ge.s32.totalorder %s1532_s14, 1  ;;  %s1532_s14 = sphi %s1559_s14, %s13_s14   ;;  %s1528_s13 = sphi %s1557_s13, %s1829_s13   ;;  %s1524_s12 = sphi %s1555_s12, %s1828_s12  }
   0x3   : > { %p27_p1 = scmp.ge.s32.totalorder %s25_s15, 2  ;;  %p157_p2 = scmp.lt.s32.totalorder %s1532_s14, 3 }
   0x5   : > { %s1831_s15 = smov (%p27_p1, %s25_s15), 0  ;;  %p158_p3 = pnand %p1330_p0, %p157_p2 }
   0x6   : > { %p189_p4 = scmp.lt.s32.totalorder (!%p158_p3), %s1524_s12, 1 }
   0x7   : > { %161 = sbr.rel (%p158_p3) target bundleno = 302 (0x12e), region = 32 }
   0xc   : > { %v1498_v0 = vld [vmem:[%s1823_s1] sm:$0xff]   ;;  %v1499_v1 = vld [vmem:[%s1823_s1 + $0x8] sm:$0xff]   ;;  %s1833_s12 = smov (!%p189_p4, %s1524_s12), 1  ;;  %v1584_v2 = vld [vmem:[%s1823_s1 + $0x10] sm:$0xff]   ;;  %vm364_vm0 = vcmask 130048   ;;  %vm1209_vm4 = vcmask 1041409  }
   0xd   : > { %1442 = vmatprep.subr.bf16.mxu1 %v1498_v0  ;;  %1432 = vmatprep.subr.bf16.mxu0 %v1499_v1  ;;  %s1472_s22 = smul.u32 72, %s1833_s12  ;;  %v1503_v3 = vld [vmem:[%s1823_s1 + $0x18] sm:$0xff]   ;;  %vm228_vm1 = vsmask.f32 3328  ;;  %vm229_vm2 = vsmask.f32 7440 }
   0xe   : > { %1443 = vmatpush3.bf16.msra.mxu1 %v1498_v0  ;;  %1433 = vmatpush3.bf16.msra.mxu0 %v1499_v1  ;;  %vm1622_vm3 = vmor %vm228_vm1, %vm229_vm2  ;;  %vm1211_vm5 = vcmask 1042434   ;;  %vm1213_vm6 = vcmask 1043459   ;;  %vm1215_vm7 = vcmask 1044484   ;;  %vm1217_vm8 = vcmask 1045509   ;;  %s1411_s30 = sshll.u32 %s1833_s12, 4 }
   0xf   : > { %1452 = vmatprep.subr.bf16.mxu0 %v1584_v2  ;;  %s1594_s27 = scalar_lea.vmem %s1822_s0, %s1472_s22  ;;  %1462 = vmatprep.subr.bf16.mxu1 %v1503_v3  ;;  %vm1219_vm9 = vcmask 1046534   ;;  %vm1221_vm10 = vcmask 1047559   ;;  %s1774_s6 = scalar_lea.vmem %s1825_s3, %s1411_s30 }
  0x10   : > { %v208_v4 = vld [vmem:[%s1594_s27] sm:$0xf]  ;;  %v1598_v5 = vld [vmem:[%s1594_s27 + $0x8] sm:$0xf]  ;;  %v1601_v6 = vld [vmem:[%s1594_s27 + $0x10] sm:$0xf] }
  0x11   : > { %v232_v7 = vshrl.u32 %v208_v4, 16  ;;  %v235_v8 = vshll.u32 %v208_v4, 16  ;;  %v246_v9 = vshrl.u32 %v1598_v5, 16  ;;  %v249_v10 = vshll.u32 %v1598_v5, 16  ;;  %v1606_v11 = vld [vmem:[%s1594_s27 + $0x18] sm:$0xf] }
  0x12   : > { %v1345_v12 = vcombine.low %v208_v4, %v1598_v5  ;;  %v1346_v13 = vcombine.low %v1601_v6, %v1606_v11  ;;  %v209_v14 = vld [vmem:[%s1594_s27 + $0x4] sm:$0x1]  ;;  %v211_v15 = vld [vmem:[%s1594_s27 + $0xc] sm:$0x1]  ;;  %v213_v16 = vld [vmem:[%s1594_s27 + $0x14] sm:$0x1] }
  0x13   : > { %v234_v17 = vrot.slane %v232_v7, 4  ;;  %v237_v18 = vrot.slane %v235_v8, 5  ;;  %v241_v19 = vshll.u32 %v209_v14, 16  ;;  %v248_v20 = vrot.slane %v246_v9, 4  ;;  %v215_v23 = vld [vmem:[%s1594_s27 + $0x1c] sm:$0x1] }
  0x14   : > { %1444 = vmatprep.mubr.msk.bf16.mxu1 %vm364_vm0, %v1345_v12  ;;  %v251_v21 = vrot.slane %v249_v10, 5  ;;  %v255_v22 = vshll.u32 %v211_v15, 16  ;;  %v260_v25 = vshrl.u32 %v1601_v6, 16  ;;  %v263_v26 = vshll.u32 %v1601_v6, 16  ;;  %v1620_v28 = vld [vmem:[%s1594_s27 + $0x20] sm:$0xf] }
  0x15   : > { %1445 = vmatmul.mubr.msk.bf16.vlgmr.msra.gmra.mxu1 %vm364_vm0, %v1346_v13  ;;  %v238_v24 = vor.u32 %v237_v18, %v234_v17  ;;  %v269_v27 = vshll.u32 %v213_v16, 16  ;;  %v243_v30 = vrot.slane %v241_v19, 5  ;;  %v274_v33 = vshrl.u32 %v1606_v11, 16  ;;  %v217_v34 = vld [vmem:[%s1594_s27 + $0x24] sm:$0x1] }
  0x16   : > { %v252_v31 = vor.u32 %v251_v21, %v248_v20  ;;  %v257_v32 = vrot.slane %v255_v22, 5  ;;  %1463 = vmatpush3.bf16.msra.mxu1 %v1503_v3  ;;  %v262_v36 = vrot.slane %v260_v25, 4  ;;  %v265_v37 = vrot.slane %v263_v26, 5  ;;  %v1634_v47 = vld [vmem:[%s1594_s27 + $0x28] sm:$0xf] }
  0x17   : > { %v239_v35 = vrot.slane %v238_v24, 4  ;;  %v271_v38 = vrot.slane %v269_v27, 5  ;;  %v276_v40 = vrot.slane %v274_v33, 4  ;;  %v277_v41 = vshll.u32 %v1606_v11, 16  ;;  %v1639_v52 = vld [vmem:[%s1594_s27 + $0x30] sm:$0xf] }
  0x18   : > { %v253_v39 = vrot.slane %v252_v31, 4  ;;  %v283_v42 = vshll.u32 %v215_v23, 16  ;;  %v266_v44 = vor.u32 %v265_v37, %v262_v36  ;;  %v288_v45 = vshrl.u32 %v1620_v28, 16  ;;  %v1642_v57 = vld [vmem:[%s1594_s27 + $0x38] sm:$0xf] }
  0x19   : > { %v244_v43 = vsel %vm1622_vm3, %v239_v35, %v243_v30  ;;  %v291_v46 = vshll.u32 %v1620_v28, 16  ;;  %v279_v49 = vrot.slane %v277_v41, 5  ;;  %v297_v51 = vshll.u32 %v217_v34, 16  ;;  %v219_v3 = vld [vmem:[%s1594_s27 + $0x2c] sm:$0x1] }
  0x1a   : > { %v258_v48 = vsel %vm1622_vm3, %v253_v39, %v257_v32  ;;  %v285_v50 = vrot.slane %v283_v42, 5  ;;  %v267_v53 = vrot.slane %v266_v44, 4  ;;  %v290_v54 = vrot.slane %v288_v45, 4  ;;  %v221_v10 = vld [vmem:[%s1594_s27 + $0x34] sm:$0x1] }
  0x1b   : > { %v293_v55 = vrot.slane %v291_v46, 5  ;;  %v1336_v56 = vcombine.low %v244_v43, %v258_v48  ;;  %v280_v58 = vor.u32 %v279_v49, %v276_v40  ;;  %v299_v59 = vrot.slane %v297_v51, 5  ;;  %v223_v19 = vld [vmem:[%s1594_s27 + $0x3c] sm:$0x1]  ;;  %v224_v24 = vld [vmem:[%s1594_s27 + $0x40] sm:$0xf] }
  0x1c   : > { %v302_v60 = vshrl.u32 %v1634_v47, 16  ;;  %v305_v61 = vshll.u32 %v1634_v47, 16  ;;  %v272_v62 = vsel %vm1622_vm3, %v267_v53, %v271_v38  ;;  %v1347_v0 = vcombine.low %v1620_v28, %v1634_v47  ;;  %v225_v31 = vld [vmem:[%s1594_s27 + $0x44] sm:$0x1] }
  0x1d   : > { %v294_v63 = vor.u32 %v293_v55, %v290_v54  ;;  %1434 = vmatprep.mubr.msk.bf16.mxu0 %vm364_vm0, %v1336_v56  ;;  %v316_v1 = vshrl.u32 %v1639_v52, 16  ;;  %v281_v4 = vrot.slane %v280_v58, 4  ;;  %v1367_v7 = vcombine.low %v258_v48, %v272_v62 }
  0x1e   : > { %v319_v8 = vshll.u32 %v1639_v52, 16  ;;  %v330_v9 = vshrl.u32 %v1642_v57, 16  ;;  %1448 = vmatprep.mubr.msk.bf16.mxu1 %vm364_vm0, %v1347_v0  ;;  %v333_v13 = vshll.u32 %v1642_v57, 16  ;;  %v1348_v14 = vcombine.low %v1639_v52, %v1642_v57 }
  0x1f   : > { %v295_v12 = vrot.slane %v294_v63, 4  ;;  %v304_v15 = vrot.slane %v302_v60, 4  ;;  %v286_v16 = vsel %vm1622_vm3, %v281_v4, %v285_v50  ;;  %v307_v17 = vrot.slane %v305_v61, 5 }
  0x20   : > { %v311_v18 = vshll.u32 %v219_v3, 16  ;;  %v318_v20 = vrot.slane %v316_v1, 4  ;;  %v1337_v21 = vcombine.low %v272_v62, %v286_v16  ;;  %1449 = vmatmul.mubr.msk.bf16.gmra.mxu1 %vm364_vm0, %v1348_v14  ;;  %v321_v22 = vrot.slane %v319_v8, 5 }
  0x21   : > { %v325_v23 = vshll.u32 %v221_v10, 16  ;;  %v300_v25 = vsel %vm1622_vm3, %v295_v12, %v299_v59  ;;  %v308_v26 = vor.u32 %v307_v17, %v304_v15  ;;  %v332_v30 = vrot.slane %v330_v9, 4  ;;  %1464 = vmatprep.mubr.msk.bf16.mxu1 %vm364_vm0, %v1367_v7 }
  0x22   : > { %v313_v27 = vrot.slane %v311_v18, 5  ;;  %1435 = vmatmul.mubr.msk.bf16.vlgmr.msra.gmra.mxu0 %vm364_vm0, %v1337_v21  ;;  %v322_v32 = vor.u32 %v321_v22, %v318_v20  ;;  %v335_v34 = vrot.slane %v333_v13, 5  ;;  %v339_v35 = vshll.u32 %v223_v19, 16  ;;  %v1408_v13 = vld [vmem:[%s1824_s2] ss:$0 sm:$0xff] }
  0x23   : > { %v327_v33 = vrot.slane %v325_v23, 5  ;;  %v1368_v36 = vcombine.low %v286_v16, %v300_v25  ;;  %1453 = vmatpush3.bf16.msra.mxu0 %v1584_v2  ;;  %v309_v37 = vrot.slane %v308_v26, 4  ;;  %v646_v38 = vshrl.u32 %v224_v24, 16 }
  0x24   : > { %v649_v39 = vshll.u32 %v224_v24, 16  ;;  %v323_v40 = vrot.slane %v322_v32, 4  ;;  %v336_v41 = vor.u32 %v335_v34, %v332_v30  ;;  %v341_v42 = vrot.slane %v339_v35, 5 }
  0x25   : > { %v655_v43 = vshll.u32 %v225_v31, 16  ;;  %v314_v44 = vsel %vm1622_vm3, %v309_v37, %v313_v27  ;;  %v648_v45 = vrot.slane %v646_v38, 4  ;;  %v1356_v55 = vcombine.low %v1598_v5, %v1601_v6 }
  0x26   : > { %v651_v46 = vrot.slane %v649_v39, 5  ;;  %v1338_v48 = vcombine.low %v300_v25, %v314_v44  ;;  %v328_v49 = vsel %vm1622_vm3, %v323_v40, %v327_v33  ;;  %v337_v50 = vrot.slane %v336_v41, 4 }
  0x27   : > { %v1369_v51 = vcombine.low %v314_v44, %v328_v49  ;;  %v657_v2 = vrot.slane %v655_v43, 5  ;;  %v1357_v61 = vcombine.low %v1606_v11, %v1620_v28  ;;  %v1358_v5 = vcombine.low %v1634_v47, %v1639_v52 }
  0x28   : > { %v652_v53 = vor.u32 %v651_v46, %v648_v45  ;;  %1438 = vmatprep.mubr.msk.bf16.mxu0 %vm364_vm0, %v1338_v48  ;;  %v342_v54 = vsel %vm1622_vm3, %v337_v50, %v341_v42  ;;  %1465 = vmatmul.mubr.msk.bf16.vlgmr.msra.gmra.mxu1 %vm364_vm0, %v1368_v36  ;;  %v1359_v6 = vcombine.low %v1642_v57, %v224_v24  ;;  %v1534_v52 = vmov 1983009808  }
  0x29   : > { %v1339_v56 = vcombine.low %v328_v49, %v342_v54  ;;  %1468 = vmatprep.mubr.msk.bf16.mxu1 %vm364_vm0, %v1369_v51  ;;  %v768_v9 = vunpack.c.l.s4 %v1534_v52  ;;  %v770_v10 = vlaneseq  ;;  %v1084_v18 = vcombine.high %v1408_v13, %v1408_v13 }
  0x2a   : > { %v653_v58 = vrot.slane %v652_v53, 4 }
  0x2b   : > { %1439 = vmatmul.mubr.msk.bf16.gmra.mxu0 %vm364_vm0, %v1339_v56  ;;  %v769_v15 = vunpack.c.0.s8 %v768_v9  ;;  %v771_v16 = vshrl.u32 %v770_v10, 7 }
  0x2c   : > { %v658_v59 = vsel %vm1622_vm3, %v653_v58, %v657_v2  ;;  %1454 = vmatprep.mubr.msk.bf16.mxu0 %vm364_vm0, %v1356_v55 }
  0x2d   : > { %v1370_v60 = vcombine.low %v342_v54, %v658_v59  ;;  %v1706_v22 = vsub.s32 %v769_v15, %v771_v16  ;;  %v1726_v53 = vsub.s32 0, %v771_v16 }
  0x2f   : > { %v1709_v26 = vrot.slane %v1084_v18, %v1706_v22  ;;  %v1712_v27 = vrot.slane %v1408_v13, %v1706_v22 }
  0x30   : > { %1469 = vmatmul.mubr.msk.bf16.gmra.mxu1 %vm364_vm0, %v1370_v60 }
  0x31   : > { %v1717_v39 = vcombine.high %v1709_v26, %v1709_v26  ;;  %v1721_v41 = vcombine.high %v1712_v27, %v1712_v27  ;;  %v1103_v51 = vrot.slane %v1709_v26, 1 }
  0x33   : > { %1455 = vmatmul.mubr.msk.bf16.vlgmr.msra.gmra.mxu0 %vm364_vm0, %v1357_v61  ;;  %v1104_v60 = vrot.slane %v1717_v39, 1  ;;  %v1101_v61 = vrot.slane %v1712_v27, 1 }
  0x34   : > { %1458 = vmatprep.mubr.msk.bf16.mxu0 %vm364_vm0, %v1358_v5  ;;  %v1102_v5 = vrot.slane %v1721_v41, 1 }
  0x3b   : > { %1459 = vmatmul.mubr.msk.bf16.gmra.mxu0 %vm364_vm0, %v1359_v6 }
  0xd5   : > { %v1446_v29 = vpop.f32.mrf.mxu1 }
  0xd7   : > { %v514_v62 = vpop.f32.mrf.mxu1 }
  0xd9   : > { %v1447_v63 = vpop.f32.mrf.mxu1 }
  0xdb   : > { %v517_v0 = vpop.f32.mrf.mxu1 }
  0xe0   : > { %v1450_v3 = vpop.f32.mrf.mxu1 }
  0xe2   : > { %v1436_v1 = vpop.f32.mrf.mxu0  ;;  %v530_v4 = vpop.f32.mrf.mxu1 }
  0xe3   : > { %v523_v19 = vadd.f32 %v1446_v29, %v1436_v1 }
  0xe4   : > { %v411_v11 = vpop.f32.mrf.mxu0  ;;  %v1695_v8 = vpop.f32.mrf.mxu1 }
  0xe5   : > { %v515_v23 = vadd.f32 %v514_v62, %v411_v11 }
  0xe6   : > { %v1437_v28 = vpop.f32.mrf.mxu0  ;;  %v1697_v57 = vpop.f32.mrf.mxu1 }
  0xe7   : > { %v526_v30 = vadd.f32 %v1447_v63, %v1437_v28 }
  0xe8   : > { %v414_v7 = vpop.f32.mrf.mxu0  ;;  %v1466_v20 = vpop.f32.mrf.mxu1 }
  0xe9   : > { %v518_v42 = vadd.f32 %v517_v0, %v414_v7 }
  0xea   : > { %v719_v31 = vpop.f32.mrf.mxu1 }
  0xeb   : > { %v1440_v47 = vpop.f32.mrf.mxu0 }
  0xec   : > { %v1467_v45 = vpop.f32.mrf.mxu1  ;;  %v539_v6 = vadd.f32 %v1450_v3, %v1440_v47 }
  0xed   : > { %v427_v12 = vpop.f32.mrf.mxu0 }
  0xee   : > { %v531_v29 = vadd.f32 %v530_v4, %v427_v12  ;;  %v722_v11 = vpop.f32.mrf.mxu1 }
  0xef   : > { %v1702_v14 = vpop.f32.mrf.mxu0 }
  0xf1   : > { %v1704_v17 = vpop.f32.mrf.mxu0 }
  0xf3   : > { %v1456_v21 = vpop.f32.mrf.mxu0 }
  0xf4   : > { %v639_v24 = vadd.f32 %v1456_v21, %v523_v19 }
  0xf5   : > { %v606_v25 = vpop.f32.mrf.mxu0 }
  0xf6   : > { %v752_v32 = vadd.f32 %v1466_v20, %v639_v24  ;;  %v637_v33 = vadd.f32 %v606_v25, %v515_v23 }
  0xf7   : > { %v1457_v34 = vpop.f32.mrf.mxu0 }
  0xf8   : > { %v800_v35 = vcombine.high %v752_v32, %v752_v32  ;;  %v807_v36 = vrot.slane %v752_v32, %v1706_v22  ;;  %v750_v37 = vadd.f32 %v719_v31, %v637_v33  ;;  %v640_v38 = vadd.f32 %v1457_v34, %v526_v30 }
  0xf9   : > { %v609_v40 = vpop.f32.mrf.mxu0 }
  0xfa   : > { %v814_v43 = vrot.slane %v800_v35, %v1706_v22  ;;  %v815_v44 = vcombine.high %v807_v36, %v807_v36  ;;  %v766_v46 = vcombine.high %v750_v37, %v750_v37  ;;  %v773_v48 = vrot.slane %v750_v37, %v1706_v22 }
  0xfb   : > { %v753_v49 = vadd.f32 %v1467_v45, %v640_v38  ;;  %v1384_v50 = vrot.slane %v807_v36, 9  ;;  %v638_v2 = vadd.f32 %v609_v40, %v518_v42  ;;  %v1460_v15 = vpop.f32.mrf.mxu0  ;;  %v1470_v38 = vpop.f32.mrf.mxu1 }
  0xfc   : > { %v816_v54 = vcombine.high %v814_v43, %v814_v43  ;;  %v1385_v55 = vrot.slane %v815_v44, 9  ;;  %v780_v56 = vrot.slane %v766_v46, %v1706_v22  ;;  %v1386_v62 = vrot.slane %v814_v43, 9 }
  0xfd   : > { %v817_v58 = vcombine.high %v753_v49, %v753_v49  ;;  %v824_v59 = vrot.slane %v753_v49, %v1706_v22  ;;  %v781_v63 = vcombine.high %v773_v48, %v773_v48  ;;  %v1733_v0 = vmax.f32 %v807_v36, %v1384_v50 }
  0xfe   : > { %v1376_v1 = vrot.slane %v773_v48, 9  ;;  %v1387_v52 = vrot.slane %v816_v54, 9  ;;  %v1039_v9 = vmax.f32 %v815_v44, %v1385_v55  ;;  %v782_v10 = vcombine.high %v780_v56, %v780_v56 }
  0xff   : > { %v831_v28 = vrot.slane %v817_v58, %v1706_v22  ;;  %v832_v7 = vcombine.high %v824_v59, %v824_v59  ;;  %v751_v13 = vadd.f32 %v722_v11, %v638_v2  ;;  %v1388_v18 = vrot.slane %v824_v59, 9  ;;  %v622_v58 = vpop.f32.mrf.mxu0 }
 0x100   : > { %v1040_v3 = vmax.f32 %v814_v43, %v1386_v62  ;;  %v1377_v4 = vrot.slane %v781_v63, 9  ;;  %v1378_v21 = vrot.slane %v780_v56, 9  ;;  %v1030_v23 = vmax.f32 %v773_v48, %v1376_v1 }
 0x101   : > { %v833_v16 = vcombine.high %v831_v28, %v831_v28  ;;  %v1389_v19 = vrot.slane %v832_v7, 9  ;;  %v1390_v20 = vrot.slane %v831_v28, 9  ;;  %v783_v47 = vcombine.high %v751_v13, %v751_v13 }
 0x102   : > { %v790_v12 = vrot.slane %v751_v13, %v1706_v22  ;;  %v643_v25 = vadd.f32 %v1460_v15, %v539_v6  ;;  %v1041_v30 = vmax.f32 %v816_v54, %v1387_v52  ;;  %v1379_v34 = vrot.slane %v782_v10, 9 }
 0x103   : > { %v1391_v24 = vrot.slane %v833_v16, 9  ;;  %v797_v31 = vrot.slane %v783_v47, %v1706_v22  ;;  %v1042_v35 = vmax.f32 %v824_v59, %v1388_v18  ;;  %v1043_v36 = vmax.f32 %v832_v7, %v1389_v19  ;;  %v1461_v18 = vpop.f32.mrf.mxu0 }
 0x104   : > { %v798_v32 = vcombine.high %v790_v12, %v790_v12  ;;  %v1380_v33 = vrot.slane %v790_v12, 9  ;;  %v1044_v37 = vmax.f32 %v831_v28, %v1390_v20  ;;  %v1031_v45 = vmax.f32 %v781_v63, %v1377_v4 }
 0x105   : > { %v799_v40 = vcombine.high %v797_v31, %v797_v31  ;;  %v1382_v43 = vrot.slane %v797_v31, 9  ;;  %v1032_v46 = vmax.f32 %v780_v56, %v1378_v21  ;;  %v1045_v48 = vmax.f32 %v833_v16, %v1391_v24 }
 0x106   : > { %v1381_v42 = vrot.slane %v798_v32, 9  ;;  %v1034_v44 = vmax.f32 %v790_v12, %v1380_v33  ;;  %v756_v49 = vadd.f32 %v1470_v38, %v643_v25  ;;  %v1033_v59 = vmax.f32 %v782_v10, %v1379_v34  ;;  %v625_v33 = vpop.f32.mrf.mxu0 }
 0x107   : > { %v1383_v50 = vrot.slane %v799_v40, 9  ;;  %v1036_v54 = vmax.f32 %v797_v31, %v1382_v43  ;;  %v1066_v6 = vmax.f32 %v1733_v0, %v1042_v35  ;;  %v1067_v62 = vmax.f32 %v1039_v9, %v1043_v36 }
 0x108   : > { %v1035_v2 = vmax.f32 %v798_v32, %v1381_v42  ;;  %v1062_v55 = vmax.f32 %v1030_v23, %v1034_v44  ;;  %v1068_v1 = vmax.f32 %v1040_v3, %v1044_v37  ;;  %v1069_v63 = vmax.f32 %v1041_v30, %v1045_v48  ;;  %v735_v3 = vpop.f32.mrf.mxu1 }
 0x109   : > { %v1037_v11 = vmax.f32 %v799_v40, %v1383_v50  ;;  %v1064_v7 = vmax.f32 %v1032_v46, %v1036_v54  ;;  %v641_v56 = vadd.f32 %v622_v58, %v531_v29  ;;  %v868_v10 = vcombine.high %v756_v49, %v756_v49 }
 0x10a   : > { %v1063_v28 = vmax.f32 %v1031_v45, %v1035_v2  ;;  %v1113_v52 = vadd.f32 %v1712_v27, %v1062_v55  ;;  %v1117_v0 = vadd.f32 %v1709_v26, %v1066_v6  ;;  %v1118_v9 = vadd.f32 %v1103_v51, %v1067_v62  ;;  %v1471_v37 = vpop.f32.mrf.mxu1 }
 0x10b   : > { %v1065_v13 = vmax.f32 %v1033_v59, %v1037_v11  ;;  %v1115_v16 = vadd.f32 %v1721_v41, %v1064_v7  ;;  %v1119_v19 = vadd.f32 %v1717_v39, %v1068_v1  ;;  %v754_v12 = vadd.f32 %v735_v3, %v641_v56 }
 0x10c   : > { %v1114_v15 = vadd.f32 %v1101_v61, %v1063_v28  ;;  %v1148_v20 = vrot.slane %v1113_v52, %v1726_v53  ;;  %v542_v21 = vadd.f32 %v1695_v8, %v1702_v14  ;;  %v534_v23 = vadd.f32 %v1697_v57, %v1704_v17  ;;  %v738_v6 = vpop.f32.mrf.mxu1 }
 0x10d   : > { %v1116_v29 = vadd.f32 %v1102_v5, %v1065_v13  ;;  %v1156_v47 = vrot.slane %v1115_v16, %v1726_v53  ;;  %v1120_v24 = vadd.f32 %v1104_v60, %v1069_v63  ;;  %v875_v31 = vrot.slane %v756_v49, %v1706_v22 }
 0x10e   : > { %v1152_v4 = vrot.slane %v1114_v15, %v1726_v53  ;;  %v882_v32 = vrot.slane %v868_v10, %v1706_v22  ;;  %v1164_v34 = vrot.slane %v1117_v0, %v1726_v53  ;;  %v834_v14 = vcombine.high %v754_v12, %v754_v12 }
 0x10f   : > { %v1160_v25 = vrot.slane %v1116_v29, %v1726_v53  ;;  %v644_v57 = vadd.f32 %v1461_v18, %v542_v21  ;;  %v1168_v17 = vrot.slane %v1118_v9, %v1726_v53  ;;  %v1172_v35 = vrot.slane %v1119_v19, %v1726_v53 }
 0x110   : > { %v1210_v30 = vsel %vm1209_vm4, %v1152_v4, %v1148_v20  ;;  %v841_v40 = vrot.slane %v754_v12, %v1706_v22  ;;  %v642_v43 = vadd.f32 %v625_v33, %v534_v23  ;;  %v1176_v44 = vrot.slane %v1120_v24, %v1726_v53 }
 0x111   : > { %v1212_v8 = vsel %vm1211_vm5, %v1156_v47, %v1210_v30  ;;  %v757_v42 = vadd.f32 %v1471_v37, %v644_v57  ;;  %v883_v46 = vcombine.high %v875_v31, %v875_v31  ;;  %v884_v48 = vcombine.high %v882_v32, %v882_v32 }
 0x112   : > { %v1214_v36 = vsel %vm1213_vm6, %v1160_v25, %v1212_v8  ;;  %v848_v50 = vrot.slane %v834_v14, %v1706_v22  ;;  %v1400_v58 = vrot.slane %v875_v31, 9  ;;  %v1402_v59 = vrot.slane %v882_v32, 9 }
 0x113   : > { %v1216_v38 = vsel %vm1215_vm7, %v1164_v34, %v1214_v36  ;;  %v885_v2 = vcombine.high %v757_v42, %v757_v42  ;;  %v892_v54 = vrot.slane %v757_v42, %v1706_v22  ;;  %v849_v62 = vcombine.high %v841_v40, %v841_v40 }
 0x114   : > { %v1218_v45 = vsel %vm1217_vm8, %v1168_v17, %v1216_v38  ;;  %v755_v28 = vadd.f32 %v738_v6, %v642_v43  ;;  %v1401_v7 = vrot.slane %v883_v46, 9  ;;  %v1403_v52 = vrot.slane %v884_v48, 9 }
 0x115   : > { %v1220_v49 = vsel %vm1219_vm9, %v1172_v35, %v1218_v45  ;;  %v899_v1 = vrot.slane %v885_v2, %v1706_v22  ;;  %v900_v11 = vcombine.high %v892_v54, %v892_v54  ;;  %v1392_v63 = vrot.slane %v841_v40, 9 }
 0x116   : > { %v1222_v55 = vsel %vm1221_vm10, %v1176_v44, %v1220_v49  ;;  %v850_v56 = vcombine.high %v848_v50, %v848_v50  ;;  %v1404_v15 = vrot.slane %v892_v54, 9  ;;  %v1054_v10 = vmax.f32 %v875_v31, %v1400_v58 }
 0x117   : > { %1232 = vst [vmem:[%s1774_s6] sm:$0xff] %v1222_v55  ;;  %v901_v13 = vcombine.high %v899_v1, %v899_v1  ;;  %v1405_v16 = vrot.slane %v900_v11, 9  ;;  %v1056_v18 = vmax.f32 %v882_v32, %v1402_v59  ;;  %v851_v0 = vcombine.high %v755_v28, %v755_v28 }
 0x118   : > { %v858_v9 = vrot.slane %v755_v28, %v1706_v22  ;;  %v1393_v19 = vrot.slane %v849_v62, 9  ;;  %v1394_v20 = vrot.slane %v848_v50, 9  ;;  %v1406_v3 = vrot.slane %v899_v1, 9 }
 0x119   : > { %v1407_v29 = vrot.slane %v901_v13, 9  ;;  %v1055_v4 = vmax.f32 %v883_v46, %v1401_v7  ;;  %v865_v47 = vrot.slane %v851_v0, %v1706_v22  ;;  %v1395_v23 = vrot.slane %v850_v56, 9 }
 0x11a   : > { %v866_v12 = vcombine.high %v858_v9, %v858_v9  ;;  %v1396_v21 = vrot.slane %v858_v9, 9  ;;  %v1046_v24 = vmax.f32 %v841_v40, %v1392_v63  ;;  %v1058_v25 = vmax.f32 %v892_v54, %v1404_v15 }
 0x11b   : > { %v1059_v30 = vmax.f32 %v900_v11, %v1405_v16  ;;  %v867_v33 = vcombine.high %v865_v47, %v865_v47  ;;  %v1398_v31 = vrot.slane %v865_v47, 9  ;;  %v1047_v8 = vmax.f32 %v849_v62, %v1393_v19 }
 0x11c   : > { %v1397_v34 = vrot.slane %v866_v12, 9  ;;  %v1050_v32 = vmax.f32 %v858_v9, %v1396_v21  ;;  %v1048_v14 = vmax.f32 %v848_v50, %v1394_v20  ;;  %v1060_v57 = vmax.f32 %v899_v1, %v1406_v3 }
 0x11d   : > { %v1061_v17 = vmax.f32 %v901_v13, %v1407_v29  ;;  %v1399_v35 = vrot.slane %v867_v33, 9  ;;  %v1052_v37 = vmax.f32 %v865_v47, %v1398_v31  ;;  %v1057_v42 = vmax.f32 %v884_v48, %v1403_v52 }
 0x11e   : > { %v1051_v36 = vmax.f32 %v866_v12, %v1397_v34  ;;  %v1070_v38 = vmax.f32 %v1046_v24, %v1050_v32  ;;  %v1049_v22 = vmax.f32 %v850_v56, %v1395_v23  ;;  %v1074_v43 = vmax.f32 %v1054_v10, %v1058_v25 }
 0x11f   : > { %v1075_v44 = vmax.f32 %v1055_v4, %v1059_v30  ;;  %v1053_v45 = vmax.f32 %v867_v33, %v1399_v35  ;;  %v1072_v46 = vmax.f32 %v1048_v14, %v1052_v37  ;;  %v1076_v2 = vmax.f32 %v1056_v18, %v1060_v57 }
 0x120   : > { %v1071_v40 = vmax.f32 %v1047_v8, %v1051_v36  ;;  %v1121_v49 = vadd.f32 %v1712_v27, %v1070_v38  ;;  %v1077_v54 = vmax.f32 %v1057_v42, %v1061_v17  ;;  %v1125_v59 = vadd.f32 %v1709_v26, %v1074_v43 }
 0x121   : > { %v1073_v55 = vmax.f32 %v1049_v22, %v1053_v45  ;;  %v1123_v58 = vadd.f32 %v1721_v41, %v1072_v46  ;;  %v1126_v48 = vadd.f32 %v1103_v51, %v1075_v44  ;;  %v1127_v27 = vadd.f32 %v1717_v39, %v1076_v2 }
 0x122   : > { %v1122_v50 = vadd.f32 %v1101_v61, %v1071_v40  ;;  %v1180_v62 = vrot.slane %v1121_v49, %v1726_v53  ;;  %v1128_v61 = vadd.f32 %v1104_v60, %v1077_v54  ;;  %v1196_v51 = vrot.slane %v1125_v59, %v1726_v53 }
 0x123   : > { %v1124_v6 = vadd.f32 %v1102_v5, %v1073_v55  ;;  %v1188_v11 = vrot.slane %v1123_v58, %v1726_v53  ;;  %v1200_v5 = vrot.slane %v1126_v48, %v1726_v53  ;;  %v1204_v52 = vrot.slane %v1127_v27, %v1726_v53 }
 0x124   : > { %v1184_v1 = vrot.slane %v1122_v50, %v1726_v53  ;;  %v1208_v56 = vrot.slane %v1128_v61, %v1726_v53 }
 0x125   : > { %v1192_v28 = vrot.slane %v1124_v6, %v1726_v53 }
 0x126   : > { %v1223_v26 = vsel %vm1209_vm4, %v1184_v1, %v1180_v62 }
 0x127   : > { %v1224_v41 = vsel %vm1211_vm5, %v1188_v11, %v1223_v26 }
 0x128   : > { %v1225_v7 = vsel %vm1213_vm6, %v1192_v28, %v1224_v41 }
 0x129   : > { %v1226_v63 = vsel %vm1215_vm7, %v1196_v51, %v1225_v7 }
 0x12a   : > { %v1227_v39 = vsel %vm1217_vm8, %v1200_v5, %v1226_v63 }
 0x12b   : > { %v1228_v60 = vsel %vm1219_vm9, %v1204_v52, %v1227_v39 }
 0x12c   : > { %v1229_v13 = vsel %vm1221_vm10, %v1208_v56, %v1228_v60 }
 0x12d   : > { %1233 = vst [vmem:[%s1774_s6 + $0x8] sm:$0xff] %v1229_v13 }
 0x12e PF: > { %s13_s14 = sadd.s32 1, %s1532_s14   ;;  %s1828_s12 = smov %s1528_s13 }
 0x12f   : > { %p10_p5 = scmp.ge.s32.totalorder %s13_s14, 4   ;;  %s1829_s13 = smov %s1831_s15 }
 0x131   :  { %12 = sbr.rel (!%p10_p5) target bundleno = 2 (0x2), region = 65 }

</bundles_post_ra>
